<compile_context>
chip_gen: v5e
topology: v5e:2x2
jax: 0.10.0
libtpu: 0.0.40
codegen_flags: <defaults>
</compile_context>

<pallas_src>
import functools

import jax
import jax.numpy as jnp
from jax import lax
from jax.experimental import pallas as pl
from jax.experimental.pallas import tpu as pltpu


def _local_hypergat_kernel(hidden_ref, H_ref, sc_ref, a1_ref, a2_ref, out_ref,
                           *, num_layers, alpha):
    """One batch block (bb samples), fully vectorized across the block."""
    f32 = jnp.float32

    h0 = hidden_ref[...].astype(f32)        # (bb, N, D)
    Hm = H_ref[...].astype(f32)             # (bb, N, E)  values in {0,1,2,3}
    sc = sc_ref[...].astype(f32)            # (bb, 1, D)  broadcasts over N
    D = h0.shape[2]

    A1 = a1_ref[...].astype(f32)            # (3, D)  rows: a10, a11, a12
    A2 = a2_ref[...].astype(f32)            # (3, D)  rows: a20, a21, a22
    a1_rows = tuple(A1[k:k + 1, :].reshape(1, 1, D) for k in range(3))
    a2_rows = tuple(A2[k:k + 1, :].reshape(1, 1, D) for k in range(3))

    # Layer-invariant block-wide tensors (hoisted out of the layer loop).
    H_adj = jnp.where(Hm > 0, 1.0, 0.0).astype(f32)   # binarized incidence
    m1 = Hm == 1.0
    m2 = Hm == 2.0
    m3 = Hm == 3.0
    neg = jnp.float32(-9.0e15)                         # torch's zero_vec fill

    # Batched dot_general dimension numbers (batch axis 0 everywhere).
    dn_sum_n = (((1,), (1,)), ((0,), (0,)))   # (b,N,E) x (b,N,D) -> (b,E,D)
    dn_sum_d = (((2,), (2,)), ((0,), (0,)))   # (b,N,D) x (b,E,D) -> (b,N,E)
    dn_sum_e = (((2,), (1,)), ((0,), (0,)))   # (b,N,E) x (b,E,D) -> (b,N,D)

    def leaky(x):
        return jnp.where(x > 0, x, alpha * x)

    def softmax(x, axis):
        # Exact normalization (reductions map to sublane (N) / lane (E) axes).
        m = jnp.max(x, axis=axis, keepdims=True)
        e = jnp.exp(x - m)
        return e / jnp.sum(e, axis=axis, keepdims=True)

    def attn_logits(h_side, edge_side, rows):
        # logits_k[b,n,e] = leaky(sum_d h_side[b,n,d] * a_k[d] * edge_side[b,e,d])
        # Scale the smaller (edge) operand by a_k; three back-to-back batched
        # matmuls pipeline on the MXU.
        def logit(k):
            return leaky(lax.dot_general(h_side, edge_side * rows[k], dn_sum_d,
                                         preferred_element_type=f32))
        masked = jnp.where(m1, logit(0), neg)
        masked = jnp.where(m2, logit(1), masked)
        masked = jnp.where(m3, logit(2), masked)
        return masked                                               # (bb, N, E)

    h_emb = h0
    acc = jnp.zeros_like(h0)
    for _ in range(num_layers):
        # edge_cluster[b,e,d] = sum_n H_adj[b,n,e] * h_emb[b,n,d]
        edge_cluster = lax.dot_general(H_adj, h_emb, dn_sum_n,
                                       preferred_element_type=f32)   # (bb, E, D)
        h_t_cluster = h_emb + sc                                      # (bb, N, D)

        # ---- node -> edge attention (softmax over N, torch dim=1) ----
        alpha1 = softmax(attn_logits(h_emb, edge_cluster, a1_rows), axis=1)
        edge = lax.dot_general(alpha1, h_emb, dn_sum_n,
                               preferred_element_type=f32)            # (bb, E, D)

        # ---- edge -> node attention (softmax over E, torch dim=2) ----
        alpha2 = softmax(attn_logits(h_t_cluster, edge, a2_rows), axis=2)
        h_emb = lax.dot_general(alpha2, edge, dn_sum_e,
                                preferred_element_type=f32)           # (bb, N, D)
        acc = acc + h_emb                                             # layer sum

    out_ref[...] = acc.astype(out_ref.dtype)     # single lane/sublane-dense store


def _dual_tensorcore_chip():
    """True on chips with 2 TensorCores per chip (v7x); False otherwise/unknown."""
    try:
        dev = jax.devices()[0]
        if dev.platform != "tpu":
            return False
        kind = str(getattr(dev, "device_kind", "")).lower()
        return "v7" in kind
    except Exception:
        return False


def _vmem_block_cap(N, E, D, budget_bytes):
    """Max samples per block so f32 tiles + live slab intermediates fit the budget."""
    io = 2 * (2 * N * D + N * E + D)                 # double-buffered hidden/H/s_c/out
    live = 4 * N * D + 5 * N * E + 2 * E * D         # h_emb, acc, h_t, logits/alpha, edges
    per_sample = 4 * (io + live)
    return max(1, budget_bytes // per_sample)


def local_hypergat_forward(hidden, H, s_c, A1, A2, *, num_layers, alpha,
                           block_b=64):
    B, N, D = hidden.shape
    E = H.shape[2]

    dual_tc = _dual_tensorcore_chip()
    vmem_budget = (16 if dual_tc else 32) * 1024 * 1024   # v7x VMEM is 64 MiB
    bb = max(1, min(block_b, B, _vmem_block_cap(N, E, D, vmem_budget)))
    if dual_tc and B >= 2:
        bb = min(bb, -(-B // 2))          # >= 2 grid steps so both TCs get work
    num_blocks = -(-B // bb)
    if dual_tc and B >= 2 and num_blocks % 2:
        num_blocks += 1                   # balanced block count across the 2 TCs
    Bp = num_blocks * bb
    if Bp != B:                           # pad batch; padded rows are sliced off
        pad = Bp - B
        hidden = jnp.pad(hidden, ((0, pad), (0, 0), (0, 0)))
        H = jnp.pad(H, ((0, pad), (0, 0), (0, 0)))
        s_c = jnp.pad(s_c, ((0, pad), (0, 0), (0, 0)))

    kernel = functools.partial(_local_hypergat_kernel,
                               num_layers=num_layers, alpha=alpha)
    out = pl.pallas_call(
        kernel,
        out_shape=jax.ShapeDtypeStruct((Bp, N, D), hidden.dtype),
        grid_spec=pltpu.PrefetchScalarGridSpec(
            num_scalar_prefetch=0,
            grid=(num_blocks,),
            in_specs=[
                pl.BlockSpec((bb, N, D), lambda b: (b, 0, 0)),   # hidden
                pl.BlockSpec((bb, N, E), lambda b: (b, 0, 0)),   # H (incidence)
                pl.BlockSpec((bb, 1, D), lambda b: (b, 0, 0)),   # s_c
                pl.BlockSpec((3, D), lambda b: (0, 0)),          # a10,a11,a12
                pl.BlockSpec((3, D), lambda b: (0, 0)),          # a20,a21,a22
            ],
            out_specs=pl.BlockSpec((bb, N, D), lambda b: (b, 0, 0)),
        ),
        compiler_params=pltpu.CompilerParams(
            dimension_semantics=("parallel",)),
    )(hidden, H, s_c, A1, A2)
    return out[:B] if Bp != B else out


def local_hypergat_reference(hidden, H, s_c, A1, A2, *, num_layers, alpha):
    """Pure-JAX transliteration of the PyTorch forward (materializes the 4-D feat)."""
    B, N, D = hidden.shape
    H_adj = jnp.where(H > 0, 1.0, 0.0)
    sc = jnp.broadcast_to(s_c, (B, N, D))
    zero_vec = -9.0e15 * jnp.ones_like(H)
    leaky = lambda x: jnp.where(x > 0, x, alpha * x)
    h_emb = hidden
    outs = []
    for _ in range(num_layers):
        edge_cluster = jnp.einsum('bne,bnd->bed', H_adj, h_emb)
        h_t = h_emb + sc
        feat = edge_cluster[:, None, :, :] * h_emb[:, :, None, :]        # (B,N,E,D)
        a1 = [leaky(jnp.einsum('bned,d->bne', feat, A1[k])) for k in range(3)]
        alpha1 = jnp.where(H == 1, a1[0], zero_vec)
        alpha1 = jnp.where(H == 2, a1[1], alpha1)
        alpha1 = jnp.where(H == 3, a1[2], alpha1)
        alpha1 = jax.nn.softmax(alpha1, axis=1)
        edge = jnp.einsum('bne,bnd->bed', alpha1, h_emb)
        feat2 = edge[:, None, :, :] * h_t[:, :, None, :]
        a2 = [leaky(jnp.einsum('bned,d->bne', feat2, A2[k])) for k in range(3)]
        alpha2 = jnp.where(H == 1, a2[0], zero_vec)
        alpha2 = jnp.where(H == 2, a2[1], alpha2)
        alpha2 = jnp.where(H == 3, a2[2], alpha2)
        alpha2 = jax.nn.softmax(alpha2, axis=2)
        h_emb = jnp.einsum('bne,bed->bnd', alpha2, edge)
        outs.append(h_emb)
    return sum(outs)


if __name__ == "__main__":
    root = jax.random.PRNGKey(0)
    key_a, key_b = jax.random.split(root)
    N, E, D = 8, 6, 32                # nodes, hyperedges, latent dim
    num_layers, alpha_slope = 2, 0.2  # LocalHyperGATlayer(dim=D, layer=2, alpha=0.2)

    def make_inputs(k, B):
        k1, k2, k3, k4, k5 = jax.random.split(k, 5)
        hidden = jax.random.normal(k1, (B, N, D), dtype=jnp.float32)
        # incidence values in {0,1,2,3} like the PyTorch H.eq(1/2/3) branches expect
        Hmat = jax.random.randint(k2, (B, N, E), 0, 4).astype(jnp.float32)
        s_c = jax.random.normal(k3, (B, 1, D), dtype=jnp.float32)
        A1 = 0.1 * jax.random.normal(k4, (3, D), dtype=jnp.float32)
        A2 = 0.1 * jax.random.normal(k5, (3, D), dtype=jnp.float32)
        return hidden, Hmat, s_c, A1, A2

    # Case 1: small batch (B=2) matching the module's documented shapes.
    hidden, Hmat, s_c, A1, A2 = make_inputs(key_a, 2)
    out = local_hypergat_forward(hidden, Hmat, s_c, A1, A2,
                                 num_layers=num_layers, alpha=alpha_slope)
    out = jax.block_until_ready(out)
    ref = local_hypergat_reference(hidden, Hmat, s_c, A1, A2,
                                   num_layers=num_layers, alpha=alpha_slope)
    assert out.shape == (2, N, D)
    assert jnp.allclose(out, ref, rtol=2e-3, atol=2e-3), "mismatch vs JAX reference (B=2)"

    # Case 2: B=5 exercises the block-wide path with an odd batch (and padding on v7x).
    hidden, Hmat, s_c, A1, A2 = make_inputs(key_b, 5)
    out = local_hypergat_forward(hidden, Hmat, s_c, A1, A2,
                                 num_layers=num_layers, alpha=alpha_slope)
    out = jax.block_until_ready(out)
    ref = local_hypergat_reference(hidden, Hmat, s_c, A1, A2,
                                   num_layers=num_layers, alpha=alpha_slope)
    assert out.shape == (5, N, D)
    assert jnp.allclose(out, ref, rtol=2e-3, atol=2e-3), "mismatch vs JAX reference (B=5)"

    print("KERNEL_OK")
</pallas_src>

<mosaic_0001>
module attributes {stable_mosaic.version = 11 : i64} {
  func.func @_local_hypergat_kernel(%arg0: i32, %arg1: memref<2x8x32xf32, #tpu.memory_space<vmem>>, %arg2: memref<2x8x6xf32, #tpu.memory_space<vmem>>, %arg3: memref<2x1x32xf32, #tpu.memory_space<vmem>>, %arg4: memref<3x32xf32, #tpu.memory_space<vmem>>, %arg5: memref<3x32xf32, #tpu.memory_space<vmem>>, %arg6: memref<2x8x32xf32, #tpu.memory_space<vmem>>) attributes {dimension_semantics = [#tpu.dimension_semantics<parallel>], iteration_bounds = array<i64: 1>, scalar_prefetch = 0 : i64, scratch_operands = 0 : i64, tpu.core_type = #tpu.core_type<tc>, window_params = [{transform_indices = @transform_0, window_bounds = array<i64: 2, 8, 32>}, {transform_indices = @transform_1, window_bounds = array<i64: 2, 8, 6>}, {transform_indices = @transform_2, window_bounds = array<i64: 2, 1, 32>}, {pipeline_mode = #tpu.pipeline_mode<synchronous>, transform_indices = @transform_3, window_bounds = array<i64: 3, 32>}, {pipeline_mode = #tpu.pipeline_mode<synchronous>, transform_indices = @transform_4, window_bounds = array<i64: 3, 32>}, {transform_indices = @transform_5, window_bounds = array<i64: 2, 8, 32>}]} {
    %c0 = arith.constant 0 : index
    %c0_0 = arith.constant 0 : index
    %c0_1 = arith.constant 0 : index
    %0 = vector.load %arg1[%c0, %c0_0, %c0_1] : memref<2x8x32xf32, #tpu.memory_space<vmem>>, vector<2x8x32xf32>
    %c0_2 = arith.constant 0 : index
    %c0_3 = arith.constant 0 : index
    %c0_4 = arith.constant 0 : index
    %1 = vector.load %arg2[%c0_2, %c0_3, %c0_4] : memref<2x8x6xf32, #tpu.memory_space<vmem>>, vector<2x8x6xf32>
    %c0_5 = arith.constant 0 : index
    %c0_6 = arith.constant 0 : index
    %c0_7 = arith.constant 0 : index
    %2 = vector.load %arg3[%c0_5, %c0_6, %c0_7] : memref<2x1x32xf32, #tpu.memory_space<vmem>>, vector<2x1x32xf32>
    %c0_8 = arith.constant 0 : index
    %c0_9 = arith.constant 0 : index
    %3 = vector.load %arg4[%c0_8, %c0_9] : memref<3x32xf32, #tpu.memory_space<vmem>>, vector<3x32xf32>
    %c0_10 = arith.constant 0 : index
    %c0_11 = arith.constant 0 : index
    %4 = vector.load %arg5[%c0_10, %c0_11] : memref<3x32xf32, #tpu.memory_space<vmem>>, vector<3x32xf32>
    %5 = vector.extract_strided_slice %3 {offsets = [0, 0], sizes = [1, 32], strides = [1, 1]} : vector<3x32xf32> to vector<1x32xf32>
    %6 = vector.shape_cast %5 : vector<1x32xf32> to vector<1x1x32xf32>
    %7 = vector.extract_strided_slice %3 {offsets = [1, 0], sizes = [1, 32], strides = [1, 1]} : vector<3x32xf32> to vector<1x32xf32>
    %8 = vector.shape_cast %7 : vector<1x32xf32> to vector<1x1x32xf32>
    %9 = vector.extract_strided_slice %3 {offsets = [2, 0], sizes = [1, 32], strides = [1, 1]} : vector<3x32xf32> to vector<1x32xf32>
    %10 = vector.shape_cast %9 : vector<1x32xf32> to vector<1x1x32xf32>
    %11 = vector.extract_strided_slice %4 {offsets = [0, 0], sizes = [1, 32], strides = [1, 1]} : vector<3x32xf32> to vector<1x32xf32>
    %12 = vector.shape_cast %11 : vector<1x32xf32> to vector<1x1x32xf32>
    %13 = vector.extract_strided_slice %4 {offsets = [1, 0], sizes = [1, 32], strides = [1, 1]} : vector<3x32xf32> to vector<1x32xf32>
    %14 = vector.shape_cast %13 : vector<1x32xf32> to vector<1x1x32xf32>
    %15 = vector.extract_strided_slice %4 {offsets = [2, 0], sizes = [1, 32], strides = [1, 1]} : vector<3x32xf32> to vector<1x32xf32>
    %16 = vector.shape_cast %15 : vector<1x32xf32> to vector<1x1x32xf32>
    %cst = arith.constant 0.000000e+00 : f32
    %17 = vector.broadcast %cst : f32 to vector<2x8x6xf32>
    %18 = arith.cmpf ogt, %1, %17 : vector<2x8x6xf32>
    %cst_12 = arith.constant 1.000000e+00 : f32
    %cst_13 = arith.constant 0.000000e+00 : f32
    %19 = vector.broadcast %cst_12 : f32 to vector<2x8x6xf32>
    %20 = vector.broadcast %cst_13 : f32 to vector<2x8x6xf32>
    %21 = arith.select %18, %19, %20 : vector<2x8x6xi1>, vector<2x8x6xf32>
    %cst_14 = arith.constant 1.000000e+00 : f32
    %22 = vector.broadcast %cst_14 : f32 to vector<2x8x6xf32>
    %23 = arith.cmpf oeq, %1, %22 : vector<2x8x6xf32>
    %cst_15 = arith.constant 2.000000e+00 : f32
    %24 = vector.broadcast %cst_15 : f32 to vector<2x8x6xf32>
    %25 = arith.cmpf oeq, %1, %24 : vector<2x8x6xf32>
    %cst_16 = arith.constant 3.000000e+00 : f32
    %26 = vector.broadcast %cst_16 : f32 to vector<2x8x6xf32>
    %27 = arith.cmpf oeq, %1, %26 : vector<2x8x6xf32>
    %cst_17 = arith.constant 0.000000e+00 : f32
    %28 = vector.broadcast %cst_17 : f32 to vector<2x8x32xf32>
    %cst_18 = arith.constant dense<0.000000e+00> : vector<2x6x32xf32>
    %29 = tpu.matmul %21, %0, %cst_18 {dimension_numbers = #tpu.dot_dimension_numbers<[1], [1], [2], [2], [0, 0, 0, 2, 1, 2], [0], [0]>} : vector<2x8x6xf32>, vector<2x8x32xf32>, vector<2x6x32xf32> -> vector<2x6x32xf32>
    %30 = vector.broadcast %2 : vector<2x1x32xf32> to vector<2x8x32xf32>
    %31 = arith.addf %0, %30 : vector<2x8x32xf32>
    %32 = vector.broadcast %6 : vector<1x1x32xf32> to vector<2x6x32xf32>
    %33 = arith.mulf %29, %32 : vector<2x6x32xf32>
    %cst_19 = arith.constant dense<0.000000e+00> : vector<2x8x6xf32>
    %34 = tpu.matmul %0, %33, %cst_19 {dimension_numbers = #tpu.dot_dimension_numbers<[2], [2], [1], [1], [0, 0, 0, 1, 1, 1], [0], [0]>} : vector<2x8x32xf32>, vector<2x6x32xf32>, vector<2x8x6xf32> -> vector<2x8x6xf32>
    %cst_20 = arith.constant 0.000000e+00 : f32
    %35 = vector.broadcast %cst_20 : f32 to vector<2x8x6xf32>
    %36 = arith.cmpf ogt, %34, %35 : vector<2x8x6xf32>
    %cst_21 = arith.constant 2.000000e-01 : f32
    %37 = vector.broadcast %cst_21 : f32 to vector<2x8x6xf32>
    %38 = arith.mulf %37, %34 : vector<2x8x6xf32>
    %39 = arith.select %36, %34, %38 : vector<2x8x6xi1>, vector<2x8x6xf32>
    %cst_22 = arith.constant -9.000000e+15 : f32
    %40 = vector.broadcast %cst_22 : f32 to vector<2x8x6xf32>
    %41 = arith.select %23, %39, %40 : vector<2x8x6xi1>, vector<2x8x6xf32>
    %42 = vector.broadcast %8 : vector<1x1x32xf32> to vector<2x6x32xf32>
    %43 = arith.mulf %29, %42 : vector<2x6x32xf32>
    %cst_23 = arith.constant dense<0.000000e+00> : vector<2x8x6xf32>
    %44 = tpu.matmul %0, %43, %cst_23 {dimension_numbers = #tpu.dot_dimension_numbers<[2], [2], [1], [1], [0, 0, 0, 1, 1, 1], [0], [0]>} : vector<2x8x32xf32>, vector<2x6x32xf32>, vector<2x8x6xf32> -> vector<2x8x6xf32>
    %cst_24 = arith.constant 0.000000e+00 : f32
    %45 = vector.broadcast %cst_24 : f32 to vector<2x8x6xf32>
    %46 = arith.cmpf ogt, %44, %45 : vector<2x8x6xf32>
    %cst_25 = arith.constant 2.000000e-01 : f32
    %47 = vector.broadcast %cst_25 : f32 to vector<2x8x6xf32>
    %48 = arith.mulf %47, %44 : vector<2x8x6xf32>
    %49 = arith.select %46, %44, %48 : vector<2x8x6xi1>, vector<2x8x6xf32>
    %50 = arith.select %25, %49, %41 : vector<2x8x6xi1>, vector<2x8x6xf32>
    %51 = vector.broadcast %10 : vector<1x1x32xf32> to vector<2x6x32xf32>
    %52 = arith.mulf %29, %51 : vector<2x6x32xf32>
    %cst_26 = arith.constant dense<0.000000e+00> : vector<2x8x6xf32>
    %53 = tpu.matmul %0, %52, %cst_26 {dimension_numbers = #tpu.dot_dimension_numbers<[2], [2], [1], [1], [0, 0, 0, 1, 1, 1], [0], [0]>} : vector<2x8x32xf32>, vector<2x6x32xf32>, vector<2x8x6xf32> -> vector<2x8x6xf32>
    %cst_27 = arith.constant 0.000000e+00 : f32
    %54 = vector.broadcast %cst_27 : f32 to vector<2x8x6xf32>
    %55 = arith.cmpf ogt, %53, %54 : vector<2x8x6xf32>
    %cst_28 = arith.constant 2.000000e-01 : f32
    %56 = vector.broadcast %cst_28 : f32 to vector<2x8x6xf32>
    %57 = arith.mulf %56, %53 : vector<2x8x6xf32>
    %58 = arith.select %55, %53, %57 : vector<2x8x6xi1>, vector<2x8x6xf32>
    %59 = arith.select %27, %58, %50 : vector<2x8x6xi1>, vector<2x8x6xf32>
    %cst_29 = arith.constant dense<0xFF800000> : vector<2x6xf32>
    %60 = vector.multi_reduction <maximumf>, %59, %cst_29 [1] : vector<2x8x6xf32> to vector<2x6xf32>
    %61 = vector.shape_cast %60 : vector<2x6xf32> to vector<2x1x6xf32>
    %62 = vector.broadcast %61 : vector<2x1x6xf32> to vector<2x8x6xf32>
    %63 = arith.subf %59, %62 : vector<2x8x6xf32>
    %64 = math.exp %63 : vector<2x8x6xf32>
    %cst_30 = arith.constant dense<0.000000e+00> : vector<2x6xf32>
    %65 = vector.multi_reduction <add>, %64, %cst_30 [1] : vector<2x8x6xf32> to vector<2x6xf32>
    %66 = vector.shape_cast %65 : vector<2x6xf32> to vector<2x1x6xf32>
    %67 = vector.broadcast %66 : vector<2x1x6xf32> to vector<2x8x6xf32>
    %68 = arith.divf %64, %67 : vector<2x8x6xf32>
    %cst_31 = arith.constant dense<0.000000e+00> : vector<2x6x32xf32>
    %69 = tpu.matmul %68, %0, %cst_31 {dimension_numbers = #tpu.dot_dimension_numbers<[1], [1], [2], [2], [0, 0, 0, 2, 1, 2], [0], [0]>} : vector<2x8x6xf32>, vector<2x8x32xf32>, vector<2x6x32xf32> -> vector<2x6x32xf32>
    %70 = vector.broadcast %12 : vector<1x1x32xf32> to vector<2x6x32xf32>
    %71 = arith.mulf %69, %70 : vector<2x6x32xf32>
    %cst_32 = arith.constant dense<0.000000e+00> : vector<2x8x6xf32>
    %72 = tpu.matmul %31, %71, %cst_32 {dimension_numbers = #tpu.dot_dimension_numbers<[2], [2], [1], [1], [0, 0, 0, 1, 1, 1], [0], [0]>} : vector<2x8x32xf32>, vector<2x6x32xf32>, vector<2x8x6xf32> -> vector<2x8x6xf32>
    %cst_33 = arith.constant 0.000000e+00 : f32
    %73 = vector.broadcast %cst_33 : f32 to vector<2x8x6xf32>
    %74 = arith.cmpf ogt, %72, %73 : vector<2x8x6xf32>
    %cst_34 = arith.constant 2.000000e-01 : f32
    %75 = vector.broadcast %cst_34 : f32 to vector<2x8x6xf32>
    %76 = arith.mulf %75, %72 : vector<2x8x6xf32>
    %77 = arith.select %74, %72, %76 : vector<2x8x6xi1>, vector<2x8x6xf32>
    %cst_35 = arith.constant -9.000000e+15 : f32
    %78 = vector.broadcast %cst_35 : f32 to vector<2x8x6xf32>
    %79 = arith.select %23, %77, %78 : vector<2x8x6xi1>, vector<2x8x6xf32>
    %80 = vector.broadcast %14 : vector<1x1x32xf32> to vector<2x6x32xf32>
    %81 = arith.mulf %69, %80 : vector<2x6x32xf32>
    %cst_36 = arith.constant dense<0.000000e+00> : vector<2x8x6xf32>
    %82 = tpu.matmul %31, %81, %cst_36 {dimension_numbers = #tpu.dot_dimension_numbers<[2], [2], [1], [1], [0, 0, 0, 1, 1, 1], [0], [0]>} : vector<2x8x32xf32>, vector<2x6x32xf32>, vector<2x8x6xf32> -> vector<2x8x6xf32>
    %cst_37 = arith.constant 0.000000e+00 : f32
    %83 = vector.broadcast %cst_37 : f32 to vector<2x8x6xf32>
    %84 = arith.cmpf ogt, %82, %83 : vector<2x8x6xf32>
    %cst_38 = arith.constant 2.000000e-01 : f32
    %85 = vector.broadcast %cst_38 : f32 to vector<2x8x6xf32>
    %86 = arith.mulf %85, %82 : vector<2x8x6xf32>
    %87 = arith.select %84, %82, %86 : vector<2x8x6xi1>, vector<2x8x6xf32>
    %88 = arith.select %25, %87, %79 : vector<2x8x6xi1>, vector<2x8x6xf32>
    %89 = vector.broadcast %16 : vector<1x1x32xf32> to vector<2x6x32xf32>
    %90 = arith.mulf %69, %89 : vector<2x6x32xf32>
    %cst_39 = arith.constant dense<0.000000e+00> : vector<2x8x6xf32>
    %91 = tpu.matmul %31, %90, %cst_39 {dimension_numbers = #tpu.dot_dimension_numbers<[2], [2], [1], [1], [0, 0, 0, 1, 1, 1], [0], [0]>} : vector<2x8x32xf32>, vector<2x6x32xf32>, vector<2x8x6xf32> -> vector<2x8x6xf32>
    %cst_40 = arith.constant 0.000000e+00 : f32
    %92 = vector.broadcast %cst_40 : f32 to vector<2x8x6xf32>
    %93 = arith.cmpf ogt, %91, %92 : vector<2x8x6xf32>
    %cst_41 = arith.constant 2.000000e-01 : f32
    %94 = vector.broadcast %cst_41 : f32 to vector<2x8x6xf32>
    %95 = arith.mulf %94, %91 : vector<2x8x6xf32>
    %96 = arith.select %93, %91, %95 : vector<2x8x6xi1>, vector<2x8x6xf32>
    %97 = arith.select %27, %96, %88 : vector<2x8x6xi1>, vector<2x8x6xf32>
    %cst_42 = arith.constant dense<0xFF800000> : vector<2x8xf32>
    %98 = vector.multi_reduction <maximumf>, %97, %cst_42 [2] : vector<2x8x6xf32> to vector<2x8xf32>
    %99 = vector.shape_cast %98 : vector<2x8xf32> to vector<2x8x1xf32>
    %100 = vector.broadcast %99 : vector<2x8x1xf32> to vector<2x8x6xf32>
    %101 = arith.subf %97, %100 : vector<2x8x6xf32>
    %102 = math.exp %101 : vector<2x8x6xf32>
    %cst_43 = arith.constant dense<0.000000e+00> : vector<2x8xf32>
    %103 = vector.multi_reduction <add>, %102, %cst_43 [2] : vector<2x8x6xf32> to vector<2x8xf32>
    %104 = vector.shape_cast %103 : vector<2x8xf32> to vector<2x8x1xf32>
    %105 = vector.broadcast %104 : vector<2x8x1xf32> to vector<2x8x6xf32>
    %106 = arith.divf %102, %105 : vector<2x8x6xf32>
    %cst_44 = arith.constant dense<0.000000e+00> : vector<2x8x32xf32>
    %107 = tpu.matmul %106, %69, %cst_44 {dimension_numbers = #tpu.dot_dimension_numbers<[2], [1], [1], [2], [0, 0, 0, 1, 1, 2], [0], [0]>} : vector<2x8x6xf32>, vector<2x6x32xf32>, vector<2x8x32xf32> -> vector<2x8x32xf32>
    %108 = arith.addf %28, %107 : vector<2x8x32xf32>
    %cst_45 = arith.constant dense<0.000000e+00> : vector<2x6x32xf32>
    %109 = tpu.matmul %21, %107, %cst_45 {dimension_numbers = #tpu.dot_dimension_numbers<[1], [1], [2], [2], [0, 0, 0, 2, 1, 2], [0], [0]>} : vector<2x8x6xf32>, vector<2x8x32xf32>, vector<2x6x32xf32> -> vector<2x6x32xf32>
    %110 = vector.broadcast %2 : vector<2x1x32xf32> to vector<2x8x32xf32>
    %111 = arith.addf %107, %110 : vector<2x8x32xf32>
    %112 = vector.broadcast %6 : vector<1x1x32xf32> to vector<2x6x32xf32>
    %113 = arith.mulf %109, %112 : vector<2x6x32xf32>
    %cst_46 = arith.constant dense<0.000000e+00> : vector<2x8x6xf32>
    %114 = tpu.matmul %107, %113, %cst_46 {dimension_numbers = #tpu.dot_dimension_numbers<[2], [2], [1], [1], [0, 0, 0, 1, 1, 1], [0], [0]>} : vector<2x8x32xf32>, vector<2x6x32xf32>, vector<2x8x6xf32> -> vector<2x8x6xf32>
    %cst_47 = arith.constant 0.000000e+00 : f32
    %115 = vector.broadcast %cst_47 : f32 to vector<2x8x6xf32>
    %116 = arith.cmpf ogt, %114, %115 : vector<2x8x6xf32>
    %cst_48 = arith.constant 2.000000e-01 : f32
    %117 = vector.broadcast %cst_48 : f32 to vector<2x8x6xf32>
    %118 = arith.mulf %117, %114 : vector<2x8x6xf32>
    %119 = arith.select %116, %114, %118 : vector<2x8x6xi1>, vector<2x8x6xf32>
    %cst_49 = arith.constant -9.000000e+15 : f32
    %120 = vector.broadcast %cst_49 : f32 to vector<2x8x6xf32>
    %121 = arith.select %23, %119, %120 : vector<2x8x6xi1>, vector<2x8x6xf32>
    %122 = vector.broadcast %8 : vector<1x1x32xf32> to vector<2x6x32xf32>
    %123 = arith.mulf %109, %122 : vector<2x6x32xf32>
    %cst_50 = arith.constant dense<0.000000e+00> : vector<2x8x6xf32>
    %124 = tpu.matmul %107, %123, %cst_50 {dimension_numbers = #tpu.dot_dimension_numbers<[2], [2], [1], [1], [0, 0, 0, 1, 1, 1], [0], [0]>} : vector<2x8x32xf32>, vector<2x6x32xf32>, vector<2x8x6xf32> -> vector<2x8x6xf32>
    %cst_51 = arith.constant 0.000000e+00 : f32
    %125 = vector.broadcast %cst_51 : f32 to vector<2x8x6xf32>
    %126 = arith.cmpf ogt, %124, %125 : vector<2x8x6xf32>
    %cst_52 = arith.constant 2.000000e-01 : f32
    %127 = vector.broadcast %cst_52 : f32 to vector<2x8x6xf32>
    %128 = arith.mulf %127, %124 : vector<2x8x6xf32>
    %129 = arith.select %126, %124, %128 : vector<2x8x6xi1>, vector<2x8x6xf32>
    %130 = arith.select %25, %129, %121 : vector<2x8x6xi1>, vector<2x8x6xf32>
    %131 = vector.broadcast %10 : vector<1x1x32xf32> to vector<2x6x32xf32>
    %132 = arith.mulf %109, %131 : vector<2x6x32xf32>
    %cst_53 = arith.constant dense<0.000000e+00> : vector<2x8x6xf32>
    %133 = tpu.matmul %107, %132, %cst_53 {dimension_numbers = #tpu.dot_dimension_numbers<[2], [2], [1], [1], [0, 0, 0, 1, 1, 1], [0], [0]>} : vector<2x8x32xf32>, vector<2x6x32xf32>, vector<2x8x6xf32> -> vector<2x8x6xf32>
    %cst_54 = arith.constant 0.000000e+00 : f32
    %134 = vector.broadcast %cst_54 : f32 to vector<2x8x6xf32>
    %135 = arith.cmpf ogt, %133, %134 : vector<2x8x6xf32>
    %cst_55 = arith.constant 2.000000e-01 : f32
    %136 = vector.broadcast %cst_55 : f32 to vector<2x8x6xf32>
    %137 = arith.mulf %136, %133 : vector<2x8x6xf32>
    %138 = arith.select %135, %133, %137 : vector<2x8x6xi1>, vector<2x8x6xf32>
    %139 = arith.select %27, %138, %130 : vector<2x8x6xi1>, vector<2x8x6xf32>
    %cst_56 = arith.constant dense<0xFF800000> : vector<2x6xf32>
    %140 = vector.multi_reduction <maximumf>, %139, %cst_56 [1] : vector<2x8x6xf32> to vector<2x6xf32>
    %141 = vector.shape_cast %140 : vector<2x6xf32> to vector<2x1x6xf32>
    %142 = vector.broadcast %141 : vector<2x1x6xf32> to vector<2x8x6xf32>
    %143 = arith.subf %139, %142 : vector<2x8x6xf32>
    %144 = math.exp %143 : vector<2x8x6xf32>
    %cst_57 = arith.constant dense<0.000000e+00> : vector<2x6xf32>
    %145 = vector.multi_reduction <add>, %144, %cst_57 [1] : vector<2x8x6xf32> to vector<2x6xf32>
    %146 = vector.shape_cast %145 : vector<2x6xf32> to vector<2x1x6xf32>
    %147 = vector.broadcast %146 : vector<2x1x6xf32> to vector<2x8x6xf32>
    %148 = arith.divf %144, %147 : vector<2x8x6xf32>
    %cst_58 = arith.constant dense<0.000000e+00> : vector<2x6x32xf32>
    %149 = tpu.matmul %148, %107, %cst_58 {dimension_numbers = #tpu.dot_dimension_numbers<[1], [1], [2], [2], [0, 0, 0, 2, 1, 2], [0], [0]>} : vector<2x8x6xf32>, vector<2x8x32xf32>, vector<2x6x32xf32> -> vector<2x6x32xf32>
    %150 = vector.broadcast %12 : vector<1x1x32xf32> to vector<2x6x32xf32>
    %151 = arith.mulf %149, %150 : vector<2x6x32xf32>
    %cst_59 = arith.constant dense<0.000000e+00> : vector<2x8x6xf32>
    %152 = tpu.matmul %111, %151, %cst_59 {dimension_numbers = #tpu.dot_dimension_numbers<[2], [2], [1], [1], [0, 0, 0, 1, 1, 1], [0], [0]>} : vector<2x8x32xf32>, vector<2x6x32xf32>, vector<2x8x6xf32> -> vector<2x8x6xf32>
    %cst_60 = arith.constant 0.000000e+00 : f32
    %153 = vector.broadcast %cst_60 : f32 to vector<2x8x6xf32>
    %154 = arith.cmpf ogt, %152, %153 : vector<2x8x6xf32>
    %cst_61 = arith.constant 2.000000e-01 : f32
    %155 = vector.broadcast %cst_61 : f32 to vector<2x8x6xf32>
    %156 = arith.mulf %155, %152 : vector<2x8x6xf32>
    %157 = arith.select %154, %152, %156 : vector<2x8x6xi1>, vector<2x8x6xf32>
    %cst_62 = arith.constant -9.000000e+15 : f32
    %158 = vector.broadcast %cst_62 : f32 to vector<2x8x6xf32>
    %159 = arith.select %23, %157, %158 : vector<2x8x6xi1>, vector<2x8x6xf32>
    %160 = vector.broadcast %14 : vector<1x1x32xf32> to vector<2x6x32xf32>
    %161 = arith.mulf %149, %160 : vector<2x6x32xf32>
    %cst_63 = arith.constant dense<0.000000e+00> : vector<2x8x6xf32>
    %162 = tpu.matmul %111, %161, %cst_63 {dimension_numbers = #tpu.dot_dimension_numbers<[2], [2], [1], [1], [0, 0, 0, 1, 1, 1], [0], [0]>} : vector<2x8x32xf32>, vector<2x6x32xf32>, vector<2x8x6xf32> -> vector<2x8x6xf32>
    %cst_64 = arith.constant 0.000000e+00 : f32
    %163 = vector.broadcast %cst_64 : f32 to vector<2x8x6xf32>
    %164 = arith.cmpf ogt, %162, %163 : vector<2x8x6xf32>
    %cst_65 = arith.constant 2.000000e-01 : f32
    %165 = vector.broadcast %cst_65 : f32 to vector<2x8x6xf32>
    %166 = arith.mulf %165, %162 : vector<2x8x6xf32>
    %167 = arith.select %164, %162, %166 : vector<2x8x6xi1>, vector<2x8x6xf32>
    %168 = arith.select %25, %167, %159 : vector<2x8x6xi1>, vector<2x8x6xf32>
    %169 = vector.broadcast %16 : vector<1x1x32xf32> to vector<2x6x32xf32>
    %170 = arith.mulf %149, %169 : vector<2x6x32xf32>
    %cst_66 = arith.constant dense<0.000000e+00> : vector<2x8x6xf32>
    %171 = tpu.matmul %111, %170, %cst_66 {dimension_numbers = #tpu.dot_dimension_numbers<[2], [2], [1], [1], [0, 0, 0, 1, 1, 1], [0], [0]>} : vector<2x8x32xf32>, vector<2x6x32xf32>, vector<2x8x6xf32> -> vector<2x8x6xf32>
    %cst_67 = arith.constant 0.000000e+00 : f32
    %172 = vector.broadcast %cst_67 : f32 to vector<2x8x6xf32>
    %173 = arith.cmpf ogt, %171, %172 : vector<2x8x6xf32>
    %cst_68 = arith.constant 2.000000e-01 : f32
    %174 = vector.broadcast %cst_68 : f32 to vector<2x8x6xf32>
    %175 = arith.mulf %174, %171 : vector<2x8x6xf32>
    %176 = arith.select %173, %171, %175 : vector<2x8x6xi1>, vector<2x8x6xf32>
    %177 = arith.select %27, %176, %168 : vector<2x8x6xi1>, vector<2x8x6xf32>
    %cst_69 = arith.constant dense<0xFF800000> : vector<2x8xf32>
    %178 = vector.multi_reduction <maximumf>, %177, %cst_69 [2] : vector<2x8x6xf32> to vector<2x8xf32>
    %179 = vector.shape_cast %178 : vector<2x8xf32> to vector<2x8x1xf32>
    %180 = vector.broadcast %179 : vector<2x8x1xf32> to vector<2x8x6xf32>
    %181 = arith.subf %177, %180 : vector<2x8x6xf32>
    %182 = math.exp %181 : vector<2x8x6xf32>
    %cst_70 = arith.constant dense<0.000000e+00> : vector<2x8xf32>
    %183 = vector.multi_reduction <add>, %182, %cst_70 [2] : vector<2x8x6xf32> to vector<2x8xf32>
    %184 = vector.shape_cast %183 : vector<2x8xf32> to vector<2x8x1xf32>
    %185 = vector.broadcast %184 : vector<2x8x1xf32> to vector<2x8x6xf32>
    %186 = arith.divf %182, %185 : vector<2x8x6xf32>
    %cst_71 = arith.constant dense<0.000000e+00> : vector<2x8x32xf32>
    %187 = tpu.matmul %186, %149, %cst_71 {dimension_numbers = #tpu.dot_dimension_numbers<[2], [1], [1], [2], [0, 0, 0, 1, 1, 2], [0], [0]>} : vector<2x8x6xf32>, vector<2x6x32xf32>, vector<2x8x32xf32> -> vector<2x8x32xf32>
    %188 = arith.addf %108, %187 : vector<2x8x32xf32>
    %c0_72 = arith.constant 0 : index
    %c0_73 = arith.constant 0 : index
    %c0_74 = arith.constant 0 : index
    %189 = vector.load %arg6[%c0_72, %c0_73, %c0_74] : memref<2x8x32xf32, #tpu.memory_space<vmem>>, vector<2x8x32xf32>
    tpu.vector_store %arg6[%c0_72, %c0_73, %c0_74], %188 {strides = array<i32>} : memref<2x8x32xf32, #tpu.memory_space<vmem>>, vector<2x8x32xf32>,
    return
  }
  func.func @transform_0(%arg0: i32) -> (i32, i32, i32) {
    %c0_i32 = arith.constant 0 : i32
    %c0_i32_0 = arith.constant 0 : i32
    %c0_i32_1 = arith.constant 0 : i32
    return %arg0, %c0_i32, %c0_i32_0 : i32, i32, i32
  }
  func.func @transform_1(%arg0: i32) -> (i32, i32, i32) {
    %c0_i32 = arith.constant 0 : i32
    %c0_i32_0 = arith.constant 0 : i32
    %c0_i32_1 = arith.constant 0 : i32
    return %arg0, %c0_i32, %c0_i32_0 : i32, i32, i32
  }
  func.func @transform_2(%arg0: i32) -> (i32, i32, i32) {
    %c0_i32 = arith.constant 0 : i32
    %c0_i32_0 = arith.constant 0 : i32
    %c0_i32_1 = arith.constant 0 : i32
    return %arg0, %c0_i32, %c0_i32_0 : i32, i32, i32
  }
  func.func @transform_3(%arg0: i32) -> (i32, i32) {
    %c0_i32 = arith.constant 0 : i32
    %c0_i32_0 = arith.constant 0 : i32
    %c0_i32_1 = arith.constant 0 : i32
    return %c0_i32, %c0_i32_0 : i32, i32
  }
  func.func @transform_4(%arg0: i32) -> (i32, i32) {
    %c0_i32 = arith.constant 0 : i32
    %c0_i32_0 = arith.constant 0 : i32
    %c0_i32_1 = arith.constant 0 : i32
    return %c0_i32, %c0_i32_0 : i32, i32
  }
  func.func @transform_5(%arg0: i32) -> (i32, i32, i32) {
    %c0_i32 = arith.constant 0 : i32
    %c0_i32_0 = arith.constant 0 : i32
    %c0_i32_1 = arith.constant 0 : i32
    return %arg0, %c0_i32, %c0_i32_0 : i32, i32, i32
  }
}

</mosaic_0001>

<bundles_post_ra>
// kernel: tpu_custom_call.1
= control target key start
LH: loop header
LB: loop body
LE: loop exit
PB: predicated region body
PF: predicated region fallthrough
CT: control target
= control target key end

     0   :  { %s1905_s0 = inlined_call_operand.vmem [shape: f32[2,8,32], index: 0, kind: input, shape index: {}]   ;;  %s1906_s1 = inlined_call_operand.vmem [shape: f32[2,8,6], index: 1, kind: input, shape index: {}]   ;;  %s1907_s2 = inlined_call_operand.vmem [shape: f32[2,1,32], index: 2, kind: input, shape index: {}]   ;;  %s1908_s3 = inlined_call_operand.vmem [shape: f32[3,32], index: 3, kind: input, shape index: {}]   ;;  %s1909_s4 = inlined_call_operand.vmem [shape: f32[3,32], index: 4, kind: input, shape index: {}]   ;;  %s1910_s5 = inlined_call_operand.hbm [shape: f32[2,8,32], index: 5, kind: output, shape index: {}]  }
   0x1   :  { %v1649_v0 = vld [vmem:[%s1906_s1] sm:$0xff]  ;;  %v1654_v1 = vld [vmem:[%s1906_s1 + $0x8] sm:$0xff] }
   0x2   :  { %vm29_vm0 = vcmp.gt.f32.partialorder %v1649_v0, 0.0  ;;  %vm30_vm1 = vcmp.gt.f32.partialorder %v1654_v1, 0.0 }
   0x3   :  { %10 = vsyncpa [#allocation3], 0  ;;  %v1612_v2 = vmov 0.0   ;;  %v1661_v6 = vld [vmem:[%s1905_s0] sm:$0xff]  ;;  %v1666_v7 = vld [vmem:[%s1905_s0 + $0x8] sm:$0xff]  ;;  %vm71_vm2 = vcmask 64512  }
   0x4   :  { %v31_v3 = vsel %vm29_vm0, 1.0, %v1612_v2  ;;  %v32_v4 = vsel %vm30_vm1, 1.0, %v1612_v2  ;;  %90 = vmatpush.msra.mxu0 %v1661_v6  ;;  %145 = vmatpush.msra.mxu1 %v1666_v7  ;;  %v27_v11 = vld [vmem:[%s1908_s3] sm:$0x7]  ;;  %vm161_vm3 = vcmask 261120   ;;  %vm34_vm6 = vcmp.eq.f32.partialorder %v1654_v1, 1.0 }
   0x5   :  { %v1545_v5 = vpack.i.bf16 %v32_v4, %v31_v3  ;;  %v1683_v12 = vperm.slane %v27_v11, 1  ;;  %v1685_v13 = vperm.slane %v27_v11, 2  ;;  %v1687_v14 = vperm.slane %v27_v11, 0  ;;  %s1465_s8 = sshll.u32 %s1910_s5, 4  ;;  %s1614_s9 = smov 128   ;;  %s1466_s8 = int_to_ptr.hbm [resolvable:$true] %s1465_s8 }
   0x6   :  { %vm33_vm8 = vcmp.eq.f32.partialorder %v1649_v0, 1.0  ;;  %vm36_vm9 = vcmp.eq.f32.partialorder %v1654_v1, 2.0  ;;  %vm35_vm11 = vcmp.eq.f32.partialorder %v1649_v0, 2.0  ;;  %vm1914_vm12 = vcmp.eq.f32.partialorder %v1649_v0, 3.0  ;;  %s1615_s10 = smov 8  }
   0x7   :  { %1546 = vxpose.xlu0.b32.start.end [1/1] (short) (narrow) %v1545_v5, 8  ;;  %vm1913_vm13 = vcmp.eq.f32.partialorder %v1654_v1, 3.0  ;;  %vm1911_vm0 = vcmask 48128  }
  0xab   :  { %v1670_v8 = vpop.trf.xlu0 }
  0xac   :  { %v1548_v9 = vunpack.i.l.bf16 %v1670_v8  ;;  %v1551_v10 = vunpack.i.h.bf16 %v1670_v8 }
  0xae   :  { %1477 = vmatmul.msk.f32.vlgmr.msra.gmra.mxu0 %vm71_vm2, %v1548_v9  ;;  %1478 = vmatmul.msk.f32.vlgmr.msra.gmra.mxu1 %vm71_vm2, %v1551_v10 }
 0x12b   :  { %v92_v15 = vpop.f32.mrf.mxu0  ;;  %v147_v16 = vpop.f32.mrf.mxu1 }
 0x12c   :  { %v223_v17 = vmul.f32 %v1683_v12, %v92_v15  ;;  %v280_v18 = vmul.f32 %v1685_v13, %v92_v15  ;;  %v224_v19 = vmul.f32 %v1683_v12, %v147_v16  ;;  %v281_v20 = vmul.f32 %v1685_v13, %v147_v16 }
 0x12d   :  { %v159_v21 = vmul.f32 %v1687_v14, %v92_v15  ;;  %v160_v22 = vmul.f32 %v1687_v14, %v147_v16 }
 0x12e   :  { %1483 = vmatpush.xpose.msk.msrb.mxu0 %vm161_vm3, %v223_v17  ;;  %1485 = vmatpush.xpose.msk.msrb.mxu1 %vm161_vm3, %v224_v19 }
 0x12f   :  { %1479 = vmatpush.xpose.msk.msra.mxu2 %vm161_vm3, %v159_v21  ;;  %1481 = vmatpush.xpose.msk.msra.mxu3 %vm161_vm3, %v160_v22 }
 0x131   :  { %1484 = vmatmul.msk.f32.vlgmr.msrb.gmra.mxu0 %vm161_vm3, %v1661_v6  ;;  %1486 = vmatmul.msk.f32.vlgmr.msrb.gmra.mxu1 %vm161_vm3, %v1666_v7 }
 0x132   :  { %1480 = vmatmul.msk.f32.vlgmr.msra.gmra.mxu2 %vm161_vm3, %v1661_v6  ;;  %1482 = vmatmul.msk.f32.vlgmr.msra.gmra.mxu3 %vm161_vm3, %v1666_v7 }
 0x133   :  { %1487 = vmatpush.xpose.msk.msrb.mxu2 %vm161_vm3, %v280_v18  ;;  %1489 = vmatpush.xpose.msk.msrb.mxu3 %vm161_vm3, %v281_v20 }
 0x134   :  { %506 = vmatpush.msra.mxu1 %v1666_v7  ;;  %451 = vmatpush.msra.mxu0 %v1661_v6 }
 0x13a   :  { %1488 = vmatmul.msk.f32.vlgmr.msrb.gmra.mxu2 %vm161_vm3, %v1661_v6  ;;  %1490 = vmatmul.msk.f32.vlgmr.msrb.gmra.mxu3 %vm161_vm3, %v1666_v7 }
 0x1ae   :  { %v268_v23 = vpop.f32.mrf.mxu1  ;;  %v245_v29 = vpop.f32.mrf.mxu0 }
 0x1af   :  { %v274_v26 = vmul.f32 0.2, %v268_v23  ;;  %vm272_vm7 = vcmp.gt.f32.partialorder %v268_v23, 0.0  ;;  %v273_v31 = vmul.f32 0.2, %v245_v29  ;;  %vm271_vm10 = vcmp.gt.f32.partialorder %v245_v29, 0.0 }
 0x1b1   :  { %v276_v34 = vsel %vm272_vm7, %v268_v23, %v274_v26  ;;  %v275_v36 = vsel %vm271_vm10, %v245_v29, %v273_v31 }
 0x1b5   :  { %v185_v24 = vpop.f32.mrf.mxu2  ;;  %v211_v25 = vpop.f32.mrf.mxu3 }
 0x1b6   :  { %v216_v27 = vmul.f32 0.2, %v185_v24  ;;  %vm215_vm4 = vcmp.gt.f32.partialorder %v211_v25, 0.0  ;;  %v217_v28 = vmul.f32 0.2, %v211_v25  ;;  %vm214_vm5 = vcmp.gt.f32.partialorder %v185_v24, 0.0 }
 0x1b8   :  { %v219_v30 = vsel %vm215_vm4, %v211_v25, %v217_v28  ;;  %v218_v32 = vsel %vm214_vm5, %v185_v24, %v216_v27 }
 0x1b9   :  { %v221_v33 = vsel %vm34_vm6, %v219_v30, -9e+15  ;;  %v220_v35 = vsel %vm33_vm8, %v218_v32, -9e+15 }
 0x1ba   :  { %v278_v37 = vsel %vm36_vm9, %v276_v34, %v221_v33  ;;  %v277_v42 = vsel %vm35_vm11, %v275_v36, %v220_v35 }
 0x1bd   :  { %v302_v38 = vpop.f32.mrf.mxu2  ;;  %v325_v39 = vpop.f32.mrf.mxu3 }
 0x1be   :  { %vm328_vm14 = vcmp.gt.f32.partialorder %v302_v38, 0.0  ;;  %v330_v40 = vmul.f32 0.2, %v302_v38  ;;  %vm329_vm15 = vcmp.gt.f32.partialorder %v325_v39, 0.0  ;;  %v331_v41 = vmul.f32 0.2, %v325_v39 }
 0x1c0   :  { %v332_v43 = vsel %vm328_vm14, %v302_v38, %v330_v40  ;;  %v333_v44 = vsel %vm329_vm15, %v325_v39, %v331_v41 }
 0x1c1   :  { %v334_v45 = vsel %vm1914_vm12, %v332_v43, %v277_v42  ;;  %v335_v46 = vsel %vm1913_vm13, %v333_v44, %v278_v37 }
 0x1c2   :  { %v337_v47 = vsel %vm1911_vm0, %v334_v45, -inf  ;;  %v344_v48 = vsel %vm1911_vm0, %v335_v46, -inf }
 0x1c3   :  { %v338_v49 = vrot.slane %v337_v47, 4  ;;  %v345_v50 = vrot.slane %v344_v48, 4 }
 0x1c5   :  { %v339_v51 = vmax.f32 %v337_v47, %v338_v49  ;;  %v346_v52 = vmax.f32 %v344_v48, %v345_v50 }
 0x1c7   :  { %v340_v53 = vrot.slane %v339_v51, 2  ;;  %v347_v54 = vrot.slane %v346_v52, 2 }
 0x1c9   :  { %v341_v55 = vmax.f32 %v339_v51, %v340_v53  ;;  %v348_v56 = vmax.f32 %v346_v52, %v347_v54  ;;  %v28_v51 = vld [vmem:[%s1909_s4] sm:$0x7] }
 0x1ca   :  { %v1742_v52 = vperm.slane %v28_v51, 0  ;;  %v1744_v53 = vperm.slane %v28_v51, 1  ;;  %v1746_v54 = vperm.slane %v28_v51, 2 }
 0x1cb   :  { %v342_v57 = vrot.slane %v341_v55, 1  ;;  %v349_v58 = vrot.slane %v348_v56, 1 }
 0x1cd   :  { %v343_v59 = vmax.f32 %v341_v55, %v342_v57  ;;  %v350_v60 = vmax.f32 %v348_v56, %v349_v58  ;;  %v1751_v55 = vld [vmem:[%s1907_s2] ss:$0 sm:$0xff]  ;;  %v1756_v56 = vld [vmem:[%s1907_s2 + $0x1] ss:$0 sm:$0xff]  ;;  %s1613_s2 = smov [#allocation2]  }
 0x1ce   :  { %s1463_s4 = sshll.u32 %s1613_s2, 4  ;;  %s1464_s4 = int_to_ptr.vmem [resolvable:$true] %s1463_s4 }
 0x1cf   :  { %v351_v61 = vsub.f32 %v334_v45, %v343_v59  ;;  %v352_v62 = vsub.f32 %v335_v46, %v350_v60 }
 0x1d1   :  { %v353_v63 = vmul.f32 1.442695, %v351_v61  ;;  %v355_v2 = vmul.f32 1.442695, %v352_v62 }
 0x1d3   :  { %1554 = vpow2.f32 %v353_v63 }
 0x1d4   :  { %1556 = vpow2.f32 %v355_v2  ;;  %v156_v2 = vadd.f32 %v1751_v55, %v1661_v6 }
 0x1d9   :  { %v1555_v3 = vpop.eup %1554 }
 0x1da   :  { %v1557_v4 = vpop.eup %1556  ;;  %v357_v5 = vsel %vm1911_vm0, %v1555_v3, 0.0 }
 0x1db   :  { %v358_v11 = vrot.slane %v357_v5, 4  ;;  %v364_v15 = vsel %vm1911_vm0, %v1557_v4, 0.0 }
 0x1dc   :  { %v365_v16 = vrot.slane %v364_v15, 4 }
 0x1dd   :  { %v359_v17 = vadd.f32 %v358_v11, %v357_v5 }
 0x1de   :  { %v366_v18 = vadd.f32 %v365_v16, %v364_v15 }
 0x1df   :  { %v360_v19 = vrot.slane %v359_v17, 2 }
 0x1e0   :  { %v367_v20 = vrot.slane %v366_v18, 2 }
 0x1e1   :  { %v361_v21 = vadd.f32 %v360_v19, %v359_v17 }
 0x1e2   :  { %v368_v22 = vadd.f32 %v367_v20, %v366_v18 }
 0x1e3   :  { %v362_v23 = vrot.slane %v361_v21, 1 }
 0x1e4   :  { %v369_v24 = vrot.slane %v368_v22, 1 }
 0x1e5   :  { %v363_v25 = vadd.f32 %v362_v23, %v361_v21 }
 0x1e6   :  { %v370_v26 = vadd.f32 %v369_v24, %v368_v22 }
 0x1e7   :  { %1558 = vrcp.f32 %v363_v25  ;;  %v382_v33 = vand.u32 2147483648, %v363_v25  ;;  %v380_v36 = vand.u32 2147483647, %v363_v25  ;;  %vm376_vm5 = vweird.f32 %v363_v25 }
 0x1e8   :  { %1560 = vrcp.f32 %v370_v26  ;;  %v397_v34 = vand.u32 2147483648, %v370_v26  ;;  %v395_v38 = vand.u32 2147483647, %v370_v26  ;;  %vm391_vm7 = vweird.f32 %v370_v26 }
 0x1e9   :  { %v383_v41 = vor.u32 1.1754944e-38, %v382_v33  ;;  %vm381_vm15 = vcmp.eq.f32.partialorder %v380_v36, 8.507059e+37 }
 0x1ea   :  { %v398_v42 = vor.u32 1.1754944e-38, %v397_v34  ;;  %vm396_vm0 = vcmp.eq.f32.partialorder %v395_v38, 8.507059e+37 }
 0x1ed   :  { %v1559_v27 = vpop.eup %1558 }
 0x1ee   :  { %v1561_v28 = vpop.eup %1560  ;;  %v372_v29 = vmul.f32 %v1559_v27, %v363_v25  ;;  %vm377_vm1 = vweird.f32 %v1559_v27 }
 0x1ef   :  { %v387_v30 = vmul.f32 %v1561_v28, %v370_v26  ;;  %vm392_vm4 = vweird.f32 %v1561_v28  ;;  %vm378_vm10 = vmor %vm376_vm5, %vm377_vm1 }
 0x1f0   :  { %v373_v31 = vsub.f32 1.0, %v372_v29  ;;  %vm393_vm14 = vmor %vm391_vm7, %vm392_vm4 }
 0x1f1   :  { %v388_v32 = vsub.f32 1.0, %v387_v30 }
 0x1f2   :  { %v374_v35 = vmul.f32 %v1559_v27, %v373_v31 }
 0x1f3   :  { %v389_v37 = vmul.f32 %v1561_v28, %v388_v32 }
 0x1f4   :  { %v375_v39 = vadd.f32 %v1559_v27, %v374_v35 }
 0x1f5   :  { %v390_v40 = vadd.f32 %v1561_v28, %v389_v37 }
 0x1f6   :  { %v379_v43 = vsel %vm378_vm10, %v1559_v27, %v375_v39 }
 0x1f7   :  { %v394_v44 = vsel %vm393_vm14, %v1561_v28, %v390_v40  ;;  %v384_v45 = vsel %vm381_vm15, %v383_v41, %v379_v43  ;;  %vm1915_vm15 = vcmask 48128  }
 0x1f8   :  { %v399_v46 = vsel %vm396_vm0, %v398_v42, %v394_v44  ;;  %v385_v47 = vmul.f32 %v1555_v3, %v384_v45  ;;  %vm1912_vm0 = vcmask 1045504   ;;  %v157_v3 = vadd.f32 %v1756_v56, %v1666_v7 }
 0x1f9   :  { %v400_v48 = vmul.f32 %v1557_v4, %v399_v46 }
 0x1fa   :  { %401 = vxpose.xlu0.b32.start.end [1/1] (short) (narrow) %v385_v47, 8 }
 0x1fb   :  { %456 = vxpose.xlu1.b32.start.end [1/1] (short) (narrow) %v400_v48, 8 }
 0x29e   :  { %v417_v49 = vpop.trf.xlu0 }
 0x29f   :  { %v472_v50 = vpop.trf.xlu1  ;;  %1491 = vmatmul.msk.f32.vlgmr.msra.gmra.mxu0 %vm71_vm2, %v417_v49 }
 0x2a0   :  { %1492 = vmatmul.msk.f32.vlgmr.msra.gmra.mxu1 %vm71_vm2, %v472_v50 }
 0x31c   :  { %v453_v57 = vpop.f32.mrf.mxu0 }
 0x31d   :  { %v512_v58 = vmul.f32 %v1742_v52, %v453_v57  ;;  %v575_v59 = vmul.f32 %v1744_v53, %v453_v57  ;;  %v632_v60 = vmul.f32 %v1746_v54, %v453_v57  ;;  %v508_v61 = vpop.f32.mrf.mxu1 }
 0x31e   :  { %v513_v62 = vmul.f32 %v1742_v52, %v508_v61  ;;  %v576_v63 = vmul.f32 %v1744_v53, %v508_v61  ;;  %v633_v4 = vmul.f32 %v1746_v54, %v508_v61 }
 0x31f   :  { %1493 = vmatpush.xpose.msk.msra.mxu2 %vm161_vm3, %v512_v58  ;;  %1497 = vmatpush.xpose.msk.msrb.mxu0 %vm161_vm3, %v575_v59 }
 0x320   :  { %1495 = vmatpush.xpose.msk.msra.mxu3 %vm161_vm3, %v513_v62  ;;  %1499 = vmatpush.xpose.msk.msrb.mxu1 %vm161_vm3, %v576_v63 }
 0x322   :  { %1494 = vmatmul.msk.f32.vlgmr.msra.gmra.mxu2 %vm161_vm3, %v156_v2  ;;  %1498 = vmatmul.msk.f32.vlgmr.msrb.gmra.mxu0 %vm161_vm3, %v156_v2 }
 0x323   :  { %1501 = vmatpush.xpose.msk.msrb.mxu2 %vm161_vm3, %v632_v60  ;;  %1505 = vmatpush.msk.msra.mxu0 %vm1912_vm0, %v453_v57 }
 0x324   :  { %1507 = vmatpush.msk.msra.mxu1 %vm1912_vm0, %v508_v61  ;;  %1496 = vmatmul.msk.f32.vlgmr.msra.gmra.mxu3 %vm161_vm3, %v157_v3 }
 0x325   :  { %1503 = vmatpush.xpose.msk.msrb.mxu3 %vm161_vm3, %v633_v4  ;;  %1500 = vmatmul.msk.f32.vlgmr.msrb.gmra.mxu1 %vm161_vm3, %v157_v3 }
 0x32a   :  { %1502 = vmatmul.msk.f32.vlgmr.msrb.gmra.mxu2 %vm161_vm3, %v156_v2 }
 0x32c   :  { %1504 = vmatmul.msk.f32.vlgmr.msrb.gmra.mxu3 %vm161_vm3, %v157_v3 }
 0x39f   :  { %v597_v15 = vpop.f32.mrf.mxu0 }
 0x3a0   :  { %v625_v19 = vmul.f32 0.2, %v597_v15  ;;  %vm623_vm7 = vcmp.gt.f32.partialorder %v597_v15, 0.0 }
 0x3a2   :  { %v620_v7 = vpop.f32.mrf.mxu1  ;;  %v627_v24 = vsel %vm623_vm7, %v597_v15, %v625_v19 }
 0x3a3   :  { %v626_v17 = vmul.f32 0.2, %v620_v7  ;;  %vm624_vm5 = vcmp.gt.f32.partialorder %v620_v7, 0.0 }
 0x3a5   :  { %v537_v6 = vpop.f32.mrf.mxu2  ;;  %v628_v22 = vsel %vm624_vm5, %v620_v7, %v626_v17 }
 0x3a6   :  { %v568_v5 = vmul.f32 0.2, %v537_v6  ;;  %vm566_vm1 = vcmp.gt.f32.partialorder %v537_v6, 0.0 }
 0x3a7   :  { %v563_v11 = vpop.f32.mrf.mxu3 }
 0x3a8   :  { %vm567_vm4 = vcmp.gt.f32.partialorder %v563_v11, 0.0  ;;  %v569_v16 = vmul.f32 0.2, %v563_v11  ;;  %v570_v20 = vsel %vm566_vm1, %v537_v6, %v568_v5  ;;  %vm1916_vm1 = vmmov %vm1915_vm15 }
 0x3a9   :  { %v572_v23 = vsel %vm33_vm8, %v570_v20, -9e+15  ;;  %vm1918_vm5 = vmmov %vm1916_vm1 }
 0x3aa   :  { %v571_v18 = vsel %vm567_vm4, %v563_v11, %v569_v16  ;;  %v629_v31 = vsel %vm35_vm11, %v627_v24, %v572_v23  ;;  %vm1917_vm4 = vmmov %vm1916_vm1 }
 0x3ab   :  { %v573_v21 = vsel %vm34_vm6, %v571_v18, -9e+15 }
 0x3ac   :  { %v630_v29 = vsel %vm36_vm9, %v628_v22, %v573_v21 }
 0x3ad   :  { %v654_v25 = vpop.f32.mrf.mxu2 }
 0x3ae   :  { %vm680_vm10 = vcmp.gt.f32.partialorder %v654_v25, 0.0  ;;  %v682_v26 = vmul.f32 0.2, %v654_v25 }
 0x3af   :  { %v677_v27 = vpop.f32.mrf.mxu3 }
 0x3b0   :  { %vm681_vm14 = vcmp.gt.f32.partialorder %v677_v27, 0.0  ;;  %v683_v28 = vmul.f32 0.2, %v677_v27  ;;  %v684_v30 = vsel %vm680_vm10, %v654_v25, %v682_v26 }
 0x3b1   :  { %v686_v33 = vsel %vm1914_vm12, %v684_v30, %v629_v31 }
 0x3b2   :  { %v685_v32 = vsel %vm681_vm14, %v677_v27, %v683_v28  ;;  %v688_v35 = vsel %vm1915_vm15, %v686_v33, -inf }
 0x3b3   :  { %v687_v34 = vsel %vm1913_vm13, %v685_v32, %v630_v29  ;;  %689 = vmax.xlane.f32.xlu1 %v688_v35  ;;  %vm1919_vm13 = vcmask 48128  }
 0x3b4   :  { %v691_v36 = vsel %vm1916_vm1, %v687_v34, -inf  ;;  %vm1920_vm12 = vmmov %vm1919_vm13 }
 0x3b5   :  { %692 = vmax.xlane.f32.xlu2 %v691_v36 }
 0x426   :  { %v690_v37 = vpop.xlane.xlu1 %689 }
 0x427   :  { %v694_v39 = vsub.f32 %v686_v33, %v690_v37 }
 0x428   :  { %v693_v38 = vpop.xlane.xlu2 %692 }
 0x429   :  { %v695_v40 = vsub.f32 %v687_v34, %v693_v38  ;;  %v696_v41 = vmul.f32 1.442695, %v694_v39 }
 0x42b   :  { %v698_v42 = vmul.f32 1.442695, %v695_v40  ;;  %1562 = vpow2.f32 %v696_v41 }
 0x42d   :  { %1564 = vpow2.f32 %v698_v42 }
 0x431   :  { %v1563_v43 = vpop.eup %1562 }
 0x432   :  { %v700_v45 = vsel %vm1917_vm4, %v1563_v43, 0.0 }
 0x433   :  { %v1565_v44 = vpop.eup %1564  ;;  %701 = vadd.xlane.f32.xlu2 %v700_v45 }
 0x434   :  { %v703_v46 = vsel %vm1918_vm5, %v1565_v44, 0.0 }
 0x435   :  { %704 = vadd.xlane.f32.xlu0 %v703_v46 }
 0x4a6   :  { %v702_v47 = vpop.xlane.xlu2 %701 }
 0x4a7   :  { %1566 = vrcp.f32 %v702_v47  ;;  %v717_v59 = vand.u32 2147483648, %v702_v47  ;;  %v715_v62 = vand.u32 2147483647, %v702_v47  ;;  %vm711_vm14 = vweird.f32 %v702_v47 }
 0x4a8   :  { %v705_v48 = vpop.xlane.xlu0 %704 }
 0x4a9   :  { %1568 = vrcp.f32 %v705_v48  ;;  %v732_v63 = vand.u32 2147483648, %v705_v48  ;;  %v730_v3 = vand.u32 2147483647, %v705_v48  ;;  %v718_v6 = vor.u32 1.1754944e-38, %v717_v59 }
 0x4aa   :  { %vm726_vm1 = vweird.f32 %v705_v48  ;;  %vm716_vm4 = vcmp.eq.f32.partialorder %v715_v62, 8.507059e+37 }
 0x4ab   :  { %v733_v11 = vor.u32 1.1754944e-38, %v732_v63  ;;  %vm731_vm0 = vcmp.eq.f32.partialorder %v730_v3, 8.507059e+37 }
 0x4ad   :  { %v1567_v49 = vpop.eup %1566 }
 0x4ae   :  { %v707_v51 = vmul.f32 %v1567_v49, %v702_v47  ;;  %vm712_vm7 = vweird.f32 %v1567_v49 }
 0x4af   :  { %v1569_v50 = vpop.eup %1568  ;;  %vm713_vm15 = vmor %vm711_vm14, %vm712_vm7 }
 0x4b0   :  { %v722_v57 = vmul.f32 %v1569_v50, %v705_v48  ;;  %v708_v58 = vsub.f32 1.0, %v707_v51  ;;  %vm727_vm10 = vweird.f32 %v1569_v50 }
 0x4b1   :  { %vm728_vm5 = vmor %vm726_vm1, %vm727_vm10  ;;  %vm1922_vm1 = vcmp.eq.f32.partialorder %v1654_v1, 3.0 }
 0x4b2   :  { %v723_v60 = vsub.f32 1.0, %v722_v57  ;;  %v709_v61 = vmul.f32 %v1567_v49, %v708_v58 }
 0x4b4   :  { %v724_v2 = vmul.f32 %v1569_v50, %v723_v60  ;;  %v710_v4 = vadd.f32 %v1567_v49, %v709_v61 }
 0x4b6   :  { %v725_v7 = vadd.f32 %v1569_v50, %v724_v2  ;;  %v714_v5 = vsel %vm713_vm15, %v1567_v49, %v710_v4  ;;  %vm1921_vm15 = vcmp.eq.f32.partialorder %v1649_v0, 3.0 }
 0x4b7   :  { %v719_v15 = vsel %vm716_vm4, %v718_v6, %v714_v5  ;;  %vm1923_vm4 = vcmask 48128  }
 0x4b8   :  { %v729_v16 = vsel %vm728_vm5, %v1569_v50, %v725_v7  ;;  %v720_v18 = vmul.f32 %v1563_v43, %v719_v15  ;;  %vm1924_vm5 = vmmov %vm1923_vm4 }
 0x4b9   :  { %v734_v17 = vsel %vm731_vm0, %v733_v11, %v729_v16 }
 0x4ba   :  { %v735_v19 = vmul.f32 %v1565_v44, %v734_v17  ;;  %1506 = vmatmul.msk.f32.vlgmr.msra.gmra.mxu0 %vm1919_vm13, %v720_v18 }
 0x4bc   :  { %1508 = vmatmul.msk.f32.vlgmr.msra.gmra.mxu1 %vm1920_vm12, %v735_v19 }
 0x537   :  { %v1800_v20 = vpop.f32.mrf.mxu0 }
 0x538   :  { %806 = vmatpush.msra.mxu2 %v1800_v20 }
 0x539   :  { %v1802_v21 = vpop.f32.mrf.mxu1  ;;  %1509 = vmatmul.msk.f32.vlgmr.msra.gmra.mxu2 %vm71_vm2, %v1548_v9 }
 0x53a   :  { %826 = vmatpush.msra.mxu3 %v1802_v21 }
 0x53b   :  { %1510 = vmatmul.msk.f32.vlgmr.msra.gmra.mxu3 %vm71_vm2, %v1551_v10 }
 0x5bc   :  { %v808_v22 = vpop.f32.mrf.mxu2 }
 0x5bd   :  { %v833_v23 = vmul.f32 %v808_v22, %v1687_v14  ;;  %v895_v24 = vmul.f32 %v808_v22, %v1683_v12  ;;  %v951_v25 = vmul.f32 %v808_v22, %v1685_v13 }
 0x5be   :  { %v828_v26 = vpop.f32.mrf.mxu3 }
 0x5bf   :  { %v834_v27 = vmul.f32 %v828_v26, %v1687_v14  ;;  %v896_v28 = vmul.f32 %v828_v26, %v1683_v12  ;;  %v952_v29 = vmul.f32 %v828_v26, %v1685_v13  ;;  %1511 = vmatpush.xpose.msk.msrb.mxu0 %vm161_vm3, %v833_v23  ;;  %1515 = vmatpush.xpose.msk.msrb.mxu2 %vm161_vm3, %v895_v24 }
 0x5c1   :  { %1513 = vmatpush.xpose.msk.msrb.mxu1 %vm161_vm3, %v834_v27  ;;  %1517 = vmatpush.xpose.msk.msrb.mxu3 %vm161_vm3, %v896_v28 }
 0x5c2   :  { %1512 = vmatmul.msk.f32.vlgmr.msrb.gmra.mxu0 %vm161_vm3, %v1800_v20  ;;  %1516 = vmatmul.msk.f32.vlgmr.msrb.gmra.mxu2 %vm161_vm3, %v1800_v20 }
 0x5c3   :  { %1519 = vmatpush.xpose.msk.msra.mxu0 %vm161_vm3, %v951_v25  ;;  %1121 = vmatpush.msra.mxu2 %v1800_v20 }
 0x5c4   :  { %1514 = vmatmul.msk.f32.vlgmr.msrb.gmra.mxu1 %vm161_vm3, %v1802_v21  ;;  %1518 = vmatmul.msk.f32.vlgmr.msrb.gmra.mxu3 %vm161_vm3, %v1802_v21 }
 0x5c5   :  { %1521 = vmatpush.xpose.msk.msra.mxu1 %vm161_vm3, %v952_v29  ;;  %1176 = vmatpush.msra.mxu3 %v1802_v21 }
 0x5ca   :  { %1520 = vmatmul.msk.f32.vlgmr.msra.gmra.mxu0 %vm161_vm3, %v1800_v20 }
 0x5cc   :  { %1522 = vmatmul.msk.f32.vlgmr.msra.gmra.mxu1 %vm161_vm3, %v1802_v21 }
 0x63f   :  { %v858_v8 = vpop.f32.mrf.mxu0 }
 0x640   :  { %v889_v10 = vmul.f32 0.2, %v858_v8  ;;  %vm887_vm12 = vcmp.gt.f32.partialorder %v858_v8, 0.0 }
 0x641   :  { %v884_v9 = vpop.f32.mrf.mxu1 }
 0x642   :  { %v890_v12 = vmul.f32 0.2, %v884_v9  ;;  %vm888_vm13 = vcmp.gt.f32.partialorder %v884_v9, 0.0  ;;  %v891_v13 = vsel %vm887_vm12, %v858_v8, %v889_v10  ;;  %vm1925_vm12 = vmmov %vm1923_vm4 }
 0x643   :  { %v893_v38 = vsel %vm33_vm8, %v891_v13, -9e+15 }
 0x644   :  { %v892_v14 = vsel %vm888_vm13, %v884_v9, %v890_v12  ;;  %vm1926_vm13 = vmmov %vm1923_vm4 }
 0x645   :  { %v917_v30 = vpop.f32.mrf.mxu2  ;;  %v894_v39 = vsel %vm34_vm6, %v892_v14, -9e+15 }
 0x646   :  { %vm943_vm0 = vcmp.gt.f32.partialorder %v917_v30, 0.0  ;;  %v945_v32 = vmul.f32 0.2, %v917_v30 }
 0x647   :  { %v940_v31 = vpop.f32.mrf.mxu3  ;;  %v973_v34 = vpop.f32.mrf.mxu0 }
 0x648   :  { %vm944_vm7 = vcmp.gt.f32.partialorder %v940_v31, 0.0  ;;  %v946_v33 = vmul.f32 0.2, %v940_v31  ;;  %vm999_vm10 = vcmp.gt.f32.partialorder %v973_v34, 0.0  ;;  %v1001_v36 = vmul.f32 0.2, %v973_v34 }
 0x649   :  { %v996_v35 = vpop.f32.mrf.mxu1  ;;  %v947_v40 = vsel %vm943_vm0, %v917_v30, %v945_v32 }
 0x64a   :  { %vm1000_vm14 = vcmp.gt.f32.partialorder %v996_v35, 0.0  ;;  %v1002_v37 = vmul.f32 0.2, %v996_v35  ;;  %v948_v41 = vsel %vm944_vm7, %v940_v31, %v946_v33  ;;  %v949_v42 = vsel %vm35_vm11, %v947_v40, %v893_v38 }
 0x64b   :  { %v950_v43 = vsel %vm36_vm9, %v948_v41, %v894_v39  ;;  %v1003_v44 = vsel %vm999_vm10, %v973_v34, %v1001_v36 }
 0x64c   :  { %v1004_v45 = vsel %vm1000_vm14, %v996_v35, %v1002_v37  ;;  %v1005_v46 = vsel %vm1921_vm15, %v1003_v44, %v949_v42 }
 0x64d   :  { %v1006_v47 = vsel %vm1922_vm1, %v1004_v45, %v950_v43  ;;  %v1007_v48 = vsel %vm1923_vm4, %v1005_v46, -inf }
 0x64e   :  { %v1014_v49 = vsel %vm1924_vm5, %v1006_v47, -inf  ;;  %v1008_v50 = vrot.slane %v1007_v48, 4 }
 0x64f   :  { %v1015_v51 = vrot.slane %v1014_v49, 4 }
 0x650   :  { %v1009_v57 = vmax.f32 %v1007_v48, %v1008_v50 }
 0x651   :  { %v1016_v58 = vmax.f32 %v1014_v49, %v1015_v51 }
 0x652   :  { %v1010_v59 = vrot.slane %v1009_v57, 2 }
 0x653   :  { %v1017_v60 = vrot.slane %v1016_v58, 2 }
 0x654   :  { %v1011_v61 = vmax.f32 %v1009_v57, %v1010_v59 }
 0x655   :  { %v1018_v62 = vmax.f32 %v1016_v58, %v1017_v60  ;;  %v831_v60 = vadd.f32 %v1751_v55, %v1800_v20  ;;  %v832_v55 = vadd.f32 %v1756_v56, %v1802_v21 }
 0x656   :  { %v1012_v63 = vrot.slane %v1011_v61, 1 }
 0x657   :  { %v1019_v2 = vrot.slane %v1018_v62, 1 }
 0x658   :  { %v1013_v3 = vmax.f32 %v1011_v61, %v1012_v63 }
 0x659   :  { %v1020_v4 = vmax.f32 %v1018_v62, %v1019_v2 }
 0x65a   :  { %v1021_v6 = vsub.f32 %v1005_v46, %v1013_v3 }
 0x65b   :  { %v1022_v7 = vsub.f32 %v1006_v47, %v1020_v4 }
 0x65c   :  { %v1023_v5 = vmul.f32 1.442695, %v1021_v6 }
 0x65d   :  { %v1025_v11 = vmul.f32 1.442695, %v1022_v7 }
 0x65e   :  { %1570 = vpow2.f32 %v1023_v5 }
 0x65f   :  { %1572 = vpow2.f32 %v1025_v11 }
 0x664   :  { %v1571_v15 = vpop.eup %1570 }
 0x665   :  { %v1573_v16 = vpop.eup %1572  ;;  %v1027_v17 = vsel %vm1925_vm12, %v1571_v15, 0.0  ;;  %vm1927_vm12 = vcmask 1045504  }
 0x666   :  { %v1028_v18 = vrot.slane %v1027_v17, 4  ;;  %v1034_v19 = vsel %vm1926_vm13, %v1573_v16, 0.0 }
 0x667   :  { %v1035_v22 = vrot.slane %v1034_v19, 4 }
 0x668   :  { %v1029_v23 = vadd.f32 %v1028_v18, %v1027_v17 }
 0x669   :  { %v1036_v24 = vadd.f32 %v1035_v22, %v1034_v19 }
 0x66a   :  { %v1030_v25 = vrot.slane %v1029_v23, 2 }
 0x66b   :  { %v1037_v26 = vrot.slane %v1036_v24, 2 }
 0x66c   :  { %v1031_v27 = vadd.f32 %v1030_v25, %v1029_v23 }
 0x66d   :  { %v1038_v28 = vadd.f32 %v1037_v26, %v1036_v24 }
 0x66e   :  { %v1032_v29 = vrot.slane %v1031_v27, 1 }
 0x66f   :  { %v1039_v8 = vrot.slane %v1038_v28, 1 }
 0x670   :  { %v1033_v9 = vadd.f32 %v1032_v29, %v1031_v27 }
 0x671   :  { %v1040_v10 = vadd.f32 %v1039_v8, %v1038_v28 }
 0x672   :  { %1574 = vrcp.f32 %v1033_v9  ;;  %v1052_v32 = vand.u32 2147483648, %v1033_v9  ;;  %v1050_v35 = vand.u32 2147483647, %v1033_v9  ;;  %vm1046_vm7 = vweird.f32 %v1033_v9 }
 0x673   :  { %1576 = vrcp.f32 %v1040_v10  ;;  %v1067_v42 = vand.u32 2147483648, %v1040_v10  ;;  %vm1061_vm1 = vweird.f32 %v1040_v10  ;;  %v1065_v44 = vand.u32 2147483647, %v1040_v10 }
 0x674   :  { %v1053_v38 = vor.u32 1.1754944e-38, %v1052_v32  ;;  %vm1051_vm14 = vcmp.eq.f32.partialorder %v1050_v35, 8.507059e+37 }
 0x675   :  { %v1068_v46 = vor.u32 1.1754944e-38, %v1067_v42  ;;  %vm1066_vm5 = vcmp.eq.f32.partialorder %v1065_v44, 8.507059e+37 }
 0x678   :  { %v1575_v12 = vpop.eup %1574 }
 0x679   :  { %v1577_v13 = vpop.eup %1576  ;;  %v1042_v14 = vmul.f32 %v1575_v12, %v1033_v9  ;;  %vm1047_vm0 = vweird.f32 %v1575_v12 }
 0x67a   :  { %v1057_v30 = vmul.f32 %v1577_v13, %v1040_v10  ;;  %vm1048_vm10 = vmor %vm1046_vm7, %vm1047_vm0  ;;  %vm1062_vm15 = vweird.f32 %v1577_v13 }
 0x67b   :  { %v1043_v31 = vsub.f32 1.0, %v1042_v14  ;;  %vm1063_vm4 = vmor %vm1061_vm1, %vm1062_vm15  ;;  %vm1930_vm15 = vcmask 48128  }
 0x67c   :  { %v1058_v33 = vsub.f32 1.0, %v1057_v30 }
 0x67d   :  { %v1044_v34 = vmul.f32 %v1575_v12, %v1043_v31 }
 0x67e   :  { %v1059_v36 = vmul.f32 %v1577_v13, %v1058_v33 }
 0x67f   :  { %v1045_v37 = vadd.f32 %v1575_v12, %v1044_v34 }
 0x680   :  { %v1060_v40 = vadd.f32 %v1577_v13, %v1059_v36 }
 0x681   :  { %v1049_v39 = vsel %vm1048_vm10, %v1575_v12, %v1045_v37 }
 0x682   :  { %v1054_v41 = vsel %vm1051_vm14, %v1053_v38, %v1049_v39  ;;  %v1064_v45 = vsel %vm1063_vm4, %v1577_v13, %v1060_v40  ;;  %vm1929_vm14 = vcmp.eq.f32.partialorder %v1649_v0, 3.0  ;;  %vm1932_vm4 = vmmov %vm1930_vm15 }
 0x683   :  { %v1055_v43 = vmul.f32 %v1571_v15, %v1054_v41  ;;  %v1069_v47 = vsel %vm1066_vm5, %v1068_v46, %v1064_v45 }
 0x684   :  { %v1070_v48 = vmul.f32 %v1573_v16, %v1069_v47 }
 0x685   :  { %1071 = vxpose.xlu2.b32.start.end [1/1] (short) (narrow) %v1055_v43, 8 }
 0x68d   :  { %1126 = vxpose.xlu2.b32.start.end [1/1] (short) (narrow) %v1070_v48, 8 }
 0x71e   :  { %v1087_v49 = vpop.trf.xlu2 }
 0x71f   :  { %1523 = vmatmul.msk.f32.vlgmr.msra.gmra.mxu2 %vm71_vm2, %v1087_v49 }
 0x726   :  { %v1142_v50 = vpop.trf.xlu2 }
 0x727   :  { %1524 = vmatmul.msk.f32.vlgmr.msra.gmra.mxu3 %vm71_vm2, %v1142_v50  ;;  %vm1928_vm2 = vmmov %vm1927_vm12 }
 0x7a2   :  { %v1123_v51 = vpop.f32.mrf.mxu2 }
 0x7a3   :  { %v1181_v57 = vmul.f32 %v1123_v51, %v1742_v52  ;;  %v1243_v58 = vmul.f32 %v1123_v51, %v1744_v53  ;;  %v1299_v59 = vmul.f32 %v1123_v51, %v1746_v54 }
 0x7a5   :  { %1525 = vmatpush.xpose.msk.msrb.mxu0 %vm161_vm3, %v1181_v57  ;;  %1529 = vmatpush.xpose.msk.msrb.mxu2 %vm161_vm3, %v1243_v58 }
 0x7a8   :  { %1526 = vmatmul.msk.f32.vlgmr.msrb.gmra.mxu0 %vm161_vm3, %v831_v60  ;;  %1530 = vmatmul.msk.f32.vlgmr.msrb.gmra.mxu2 %vm161_vm3, %v831_v60 }
 0x7a9   :  { %1537 = vmatpush.msk.msra.mxu2 %vm1927_vm12, %v1123_v51  ;;  %1533 = vmatpush.xpose.msk.msra.mxu0 %vm161_vm3, %v1299_v59 }
 0x7aa   :  { %v1178_v61 = vpop.f32.mrf.mxu3 }
 0x7ab   :  { %v1182_v62 = vmul.f32 %v1178_v61, %v1742_v52  ;;  %v1244_v63 = vmul.f32 %v1178_v61, %v1744_v53  ;;  %v1300_v2 = vmul.f32 %v1178_v61, %v1746_v54 }
 0x7ad   :  { %1527 = vmatpush.xpose.msk.msrb.mxu1 %vm161_vm3, %v1182_v62  ;;  %1531 = vmatpush.xpose.msk.msrb.mxu3 %vm161_vm3, %v1244_v63 }
 0x7b0   :  { %1528 = vmatmul.msk.f32.vlgmr.msrb.gmra.mxu1 %vm161_vm3, %v832_v55  ;;  %1532 = vmatmul.msk.f32.vlgmr.msrb.gmra.mxu3 %vm161_vm3, %v832_v55 }
 0x7b1   :  { %1539 = vmatpush.msk.msra.mxu3 %vm1928_vm2, %v1178_v61  ;;  %1535 = vmatpush.xpose.msk.msra.mxu1 %vm161_vm3, %v1300_v2 }
 0x7b2   :  { %1534 = vmatmul.msk.f32.vlgmr.msra.gmra.mxu0 %vm161_vm3, %v831_v60 }
 0x7b8   :  { %1536 = vmatmul.msk.f32.vlgmr.msra.gmra.mxu1 %vm161_vm3, %v832_v55 }
 0x825   :  { %v1206_v52 = vpop.f32.mrf.mxu0 }
 0x826   :  { %v1237_v53 = vmul.f32 0.2, %v1206_v52  ;;  %vm1235_vm13 = vcmp.gt.f32.partialorder %v1206_v52, 0.0 }
 0x828   :  { %v1239_v54 = vsel %vm1235_vm13, %v1206_v52, %v1237_v53 }
 0x829   :  { %v1241_v7 = vsel %vm33_vm8, %v1239_v54, -9e+15 }
 0x82b   :  { %v1265_v3 = vpop.f32.mrf.mxu2 }
 0x82c   :  { %vm1291_vm0 = vcmp.gt.f32.partialorder %v1265_v3, 0.0  ;;  %v1293_v4 = vmul.f32 0.2, %v1265_v3 }
 0x82d   :  { %v1232_v6 = vpop.f32.mrf.mxu1 }
 0x82e   :  { %v1295_v56 = vsel %vm1291_vm0, %v1265_v3, %v1293_v4  ;;  %v1238_v11 = vmul.f32 0.2, %v1232_v6  ;;  %vm1236_vm10 = vcmp.gt.f32.partialorder %v1232_v6, 0.0 }
 0x82f   :  { %v1321_v5 = vpop.f32.mrf.mxu0  ;;  %v1297_v16 = vsel %vm35_vm11, %v1295_v56, %v1241_v7  ;;  %vm1931_vm11 = vcmp.eq.f32.partialorder %v1654_v1, 3.0 }
 0x830   :  { %vm1347_vm7 = vcmp.gt.f32.partialorder %v1321_v5, 0.0  ;;  %v1349_v15 = vmul.f32 0.2, %v1321_v5  ;;  %v1240_v19 = vsel %vm1236_vm10, %v1232_v6, %v1238_v11 }
 0x831   :  { %v1242_v26 = vsel %vm34_vm6, %v1240_v19, -9e+15  ;;  %vm1933_vm6 = vmmov %vm1932_vm4 }
 0x832   :  { %v1351_v17 = vsel %vm1347_vm7, %v1321_v5, %v1349_v15  ;;  %vm1935_vm7 = vmmov %vm1932_vm4 }
 0x833   :  { %v1353_v18 = vsel %vm1929_vm14, %v1351_v17, %v1297_v16  ;;  %v1288_v23 = vpop.f32.mrf.mxu3 }
 0x834   :  { %v1355_v22 = vsel %vm1930_vm15, %v1353_v18, -inf  ;;  %vm1292_vm1 = vcmp.gt.f32.partialorder %v1288_v23, 0.0  ;;  %v1294_v24 = vmul.f32 0.2, %v1288_v23 }
 0x835   :  { %1356 = vmax.xlane.f32.xlu2 %v1355_v22  ;;  %v1344_v25 = vpop.f32.mrf.mxu1 }
 0x836   :  { %v1296_v27 = vsel %vm1292_vm1, %v1288_v23, %v1294_v24  ;;  %vm1348_vm8 = vcmp.gt.f32.partialorder %v1344_v25, 0.0  ;;  %v1350_v28 = vmul.f32 0.2, %v1344_v25  ;;  %vm1936_vm1 = vmmov %vm1932_vm4 }
 0x837   :  { %v1298_v29 = vsel %vm36_vm9, %v1296_v27, %v1242_v26  ;;  %vm1934_vm9 = vmmov %vm1932_vm4 }
 0x838   :  { %v1352_v8 = vsel %vm1348_vm8, %v1344_v25, %v1350_v28 }
 0x839   :  { %v1354_v0 = vsel %vm1931_vm11, %v1352_v8, %v1298_v29 }
 0x83a   :  { %v1358_v9 = vsel %vm1932_vm4, %v1354_v0, -inf }
 0x83b   :  { %1359 = vmax.xlane.f32.xlu1 %v1358_v9 }
 0x8a8   :  { %v1357_v10 = vpop.xlane.xlu2 %1356 }
 0x8a9   :  { %v1361_v12 = vsub.f32 %v1353_v18, %v1357_v10 }
 0x8ab   :  { %v1363_v13 = vmul.f32 1.442695, %v1361_v12 }
 0x8ad   :  { %1578 = vpow2.f32 %v1363_v13 }
 0x8ae   :  { %v1360_v14 = vpop.xlane.xlu1 %1359 }
 0x8af   :  { %v1362_v30 = vsub.f32 %v1354_v0, %v1360_v14 }
 0x8b1   :  { %v1365_v31 = vmul.f32 1.442695, %v1362_v30 }
 0x8b3   :  { %v1579_v32 = vpop.eup %1578  ;;  %1580 = vpow2.f32 %v1365_v31 }
 0x8b4   :  { %v1367_v33 = vsel %vm1933_vm6, %v1579_v32, 0.0 }
 0x8b5   :  { %1368 = vadd.xlane.f32.xlu1 %v1367_v33 }
 0x8b9   :  { %v1581_v34 = vpop.eup %1580 }
 0x8ba   :  { %v1370_v35 = vsel %vm1934_vm9, %v1581_v34, 0.0 }
 0x8bd   :  { %1371 = vadd.xlane.f32.xlu1 %v1370_v35 }
 0x928   :  { %v1369_v1 = vpop.xlane.xlu1 %1368 }
 0x929   :  { %1582 = vrcp.f32 %v1369_v1  ;;  %v1384_v40 = vand.u32 2147483648, %v1369_v1  ;;  %v1382_v42 = vand.u32 2147483647, %v1369_v1  ;;  %vm1378_vm12 = vweird.f32 %v1369_v1 }
 0x92b   :  { %v1385_v45 = vor.u32 1.1754944e-38, %v1384_v40  ;;  %vm1383_vm13 = vcmp.eq.f32.partialorder %v1382_v42, 8.507059e+37 }
 0x92f   :  { %v1583_v36 = vpop.eup %1582 }
 0x930   :  { %v1374_v37 = vmul.f32 %v1583_v36, %v1369_v1  ;;  %v1372_v38 = vpop.xlane.xlu1 %1371  ;;  %vm1379_vm5 = vweird.f32 %v1583_v36 }
 0x931   :  { %1584 = vrcp.f32 %v1372_v38  ;;  %vm1380_vm2 = vmor %vm1378_vm12, %vm1379_vm5  ;;  %v1399_v51 = vand.u32 2147483648, %v1372_v38  ;;  %v1397_v58 = vand.u32 2147483647, %v1372_v38  ;;  %vm1393_vm10 = vweird.f32 %v1372_v38 }
 0x932   :  { %v1375_v39 = vsub.f32 1.0, %v1374_v37 }
 0x933   :  { %v1400_v60 = vor.u32 1.1754944e-38, %v1399_v51  ;;  %vm1398_vm15 = vcmp.eq.f32.partialorder %v1397_v58, 8.507059e+37 }
 0x934   :  { %v1376_v41 = vmul.f32 %v1583_v36, %v1375_v39 }
 0x936   :  { %v1377_v43 = vadd.f32 %v1583_v36, %v1376_v41 }
 0x937   :  { %v1585_v44 = vpop.eup %1584 }
 0x938   :  { %v1381_v46 = vsel %vm1380_vm2, %v1583_v36, %v1377_v43  ;;  %v1389_v47 = vmul.f32 %v1585_v44, %v1372_v38  ;;  %vm1394_vm0 = vweird.f32 %v1585_v44 }
 0x939   :  { %v1386_v48 = vsel %vm1383_vm13, %v1385_v45, %v1381_v46  ;;  %vm1395_vm14 = vmor %vm1393_vm10, %vm1394_vm0 }
 0x93a   :  { %v1390_v49 = vsub.f32 1.0, %v1389_v47  ;;  %v1387_v50 = vmul.f32 %v1579_v32, %v1386_v48 }
 0x93c   :  { %v1391_v57 = vmul.f32 %v1585_v44, %v1390_v49  ;;  %1538 = vmatmul.msk.f32.vlgmr.msra.gmra.mxu2 %vm1935_vm7, %v1387_v50 }
 0x93e   :  { %v1392_v59 = vadd.f32 %v1585_v44, %v1391_v57 }
 0x940   :  { %v1396_v61 = vsel %vm1395_vm14, %v1585_v44, %v1392_v59 }
 0x941   :  { %v1401_v62 = vsel %vm1398_vm15, %v1400_v60, %v1396_v61 }
 0x942   :  { %v1402_v63 = vmul.f32 %v1581_v34, %v1401_v62 }
 0x944   :  { %1540 = vmatmul.msk.f32.vlgmr.msra.gmra.mxu3 %vm1936_vm1, %v1402_v63 }
 0x9bf   :  { %v1426_v2 = vpop.f32.mrf.mxu2 }
 0x9c0   :  { %v1455_v55 = vadd.f32 %v1426_v2, %v1800_v20 }
 0x9c2   :  { %1457 = vst.msk [vmem:[#allocation2] sm:$0xff] %vm161_vm3, %v1455_v55 }
 0x9c7   :  { %v1452_v52 = vpop.f32.mrf.mxu3 }
 0x9c8   :  { %v1456_v53 = vadd.f32 %v1452_v52, %v1802_v21 }
 0x9ca   :  { %1458 = vst.msk [vmem:[#allocation2 + $0x8] sm:$0xff] %vm161_vm3, %v1456_v53 }
 0x9cb   :  { %1471 = dma.vmem_to_hbm [thread:$0]  %s1464_s4, 256, %s1466_s8, [#allocation3], %s1614_s9, %s1614_s9, %s1615_s10  }
 0x9cc   :  { %1610 = dma.done.wait [#allocation3], 256  }
 0x9cd   :  { %1611 = vsyncadd [#allocation3], 4294967040 }
 0x9ce   :  { %1476 = vsyncpa [#allocation3], 1 }

</bundles_post_ra>
